<compile_context>
chip_gen: v7x
topology: tpu7x:2x2x1
jax: 0.10.0
libtpu: 0.0.40
codegen_flags: <defaults>
</compile_context>

<pallas_src>
import math

import jax
import jax.numpy as jnp
from jax.experimental import pallas as pl
from jax.experimental.pallas import tpu as pltpu


def _normalize_kernel(x_ref, mean_ref, inv_std_ref, o_ref):
    # f32 math in-register; I/O stays in the native dtype.
    xf = x_ref[...].astype(jnp.float32)
    o_ref[...] = ((xf - mean_ref[...]) * inv_std_ref[...]).astype(o_ref.dtype)


def _denormalize_kernel(x_ref, mean_ref, std_ref, o_ref):
    xf = x_ref[...].astype(jnp.float32)
    o_ref[...] = (xf * std_ref[...] + mean_ref[...]).astype(o_ref.dtype)


def _round_up(a, b):
    return ((a + b - 1) // b) * b


def gaussian_normalizer_forward(x, mean, std, *, eps=1e-8, inverse=False,
                                target_tile_bytes=2 * 1024 * 1024):
    """Pallas implementation of GaussianNormalizer.forward.

    x:    (..., D) float (any float dtype; kept native end-to-end)
    mean: broadcastable feature vector with D elements
    std:  broadcastable feature vector with D elements
    """
    orig_shape = x.shape
    orig_dtype = x.dtype
    itemsize = x.dtype.itemsize
    packing = max(8, 32 // itemsize)          # sublanes per 32-bit row: f32=8, bf16=16

    mean = mean.astype(jnp.float32).reshape(-1)
    std = std.astype(jnp.float32).reshape(-1)
    d = mean.shape[0]
    x2d = x.reshape(-1, d)                    # free reshape (row-major)
    n = x2d.shape[0]

    # Per-feature vector: inverse path multiplies by raw std (matches torch),
    # forward uses exact reciprocal of clamp(std, eps), computed once here.
    vec = std if inverse else 1.0 / jnp.maximum(std, eps)

    # ---- lane folding: make the lane dim a multiple of 128 whenever cheap ----
    max_lane = 16384
    if d % 128 != 0:
        f = 128 // math.gcd(d, 128)           # lcm(d,128)/d
        if f * d > max_lane:
            f = 1                             # fall back to full-dim lane
    else:
        f = 1
    lane = f * d

    mean_t = (jnp.tile(mean, f) if f > 1 else mean).reshape(1, lane)
    vec_t = (jnp.tile(vec, f) if f > 1 else vec).reshape(1, lane)

    # Pad by at most f-1 rows so the fold reshape is a pure bitcast.
    pad_rows = (-n) % f
    if pad_rows:
        x2d = jnp.pad(x2d, ((0, pad_rows), (0, 0)))
    n_fold = (n + pad_rows) // f
    x_folded = x2d.reshape(n_fold, lane)

    # ---- tile sizing: ~2 MiB input tiles, dtype-aware sublane packing ----
    rows_per_tile = max(
        packing, (target_tile_bytes // (lane * itemsize)) // packing * packing)
    # Keep at least a few grid steps when there is enough work (v7x: 2 TCs).
    min_blocks = 4
    if n_fold > min_blocks * packing:
        rows_per_tile = min(rows_per_tile,
                            _round_up(pl.cdiv(n_fold, min_blocks), packing))
    # Either the full row extent (always legal) or a packing-aligned tile.
    block_rows = n_fold if n_fold <= rows_per_tile else rows_per_tile
    grid = (pl.cdiv(n_fold, block_rows),)     # partial last block handled by Pallas

    tile_bytes = block_rows * lane * itemsize           # input tile == output tile
    vmem_limit = int(min(32 * 1024 * 1024,              # safe under v7x 64 MiB VMEM
                         max(8 * 1024 * 1024,
                             6 * tile_bytes + 4 * lane * 4)))

    kernel = _denormalize_kernel if inverse else _normalize_kernel

    out = pl.pallas_call(
        kernel,
        out_shape=jax.ShapeDtypeStruct((n_fold, lane), orig_dtype),
        grid_spec=pltpu.PrefetchScalarGridSpec(
            num_scalar_prefetch=0,
            grid=grid,
            in_specs=[
                pl.BlockSpec((block_rows, lane), lambda i: (i, 0)),  # x tile (native dtype)
                pl.BlockSpec((1, lane), lambda i: (0, 0)),           # mean (resident, f32)
                pl.BlockSpec((1, lane), lambda i: (0, 0)),           # inv_std / std (f32)
            ],
            out_specs=pl.BlockSpec((block_rows, lane), lambda i: (i, 0)),
        ),
        compiler_params=pltpu.CompilerParams(
            dimension_semantics=("parallel",),
            vmem_limit_bytes=vmem_limit),
    )(x_folded, mean_t, vec_t)

    out2d = out.reshape(n_fold * f, d)        # free bitcast reshape
    if pad_rows:
        out2d = out2d[:n]
    return out2d.reshape(orig_shape)


if __name__ == "__main__":
    EPS = 1e-8
    key = jax.random.PRNGKey(0)
    keys = jax.random.split(key, 9)

    # Case 1: f32, D=32 -> lane folding f=4, no row padding, single block.
    N, D = 16, 32
    x = jax.random.normal(keys[0], (N, D), dtype=jnp.float32)
    mean = jax.random.normal(keys[1], (D,), dtype=jnp.float32)
    std = jnp.abs(jax.random.normal(keys[2], (D,), dtype=jnp.float32)) + 0.1

    y = jax.block_until_ready(
        gaussian_normalizer_forward(x, mean, std, eps=EPS, inverse=False))
    y_ref = (x - mean[None, :]) / jnp.maximum(std[None, :], EPS)
    assert jnp.allclose(y, y_ref, atol=1e-5, rtol=1e-5)

    z = jax.block_until_ready(
        gaussian_normalizer_forward(y, mean, std, eps=EPS, inverse=True))
    z_ref = y * std[None, :] + mean[None, :]
    assert jnp.allclose(z, z_ref, atol=1e-5, rtol=1e-5)

    # Case 2: f32, N=300, D=48 -> generalized folding f=8 (lane=384),
    # 4 padded rows, cdiv grid with a partial last block.
    N2, D2 = 300, 48
    x2 = jax.random.normal(keys[3], (N2, D2), dtype=jnp.float32)
    mean2 = jax.random.normal(keys[4], (D2,), dtype=jnp.float32)
    std2 = jnp.abs(jax.random.normal(keys[5], (D2,), dtype=jnp.float32)) + 0.1

    y2 = jax.block_until_ready(
        gaussian_normalizer_forward(x2, mean2, std2, eps=EPS, inverse=False))
    y2_ref = (x2 - mean2[None, :]) / jnp.maximum(std2[None, :], EPS)
    assert jnp.allclose(y2, y2_ref, atol=1e-5, rtol=1e-5)

    z2 = jax.block_until_ready(
        gaussian_normalizer_forward(y2, mean2, std2, eps=EPS, inverse=True))
    z2_ref = y2 * std2[None, :] + mean2[None, :]
    assert jnp.allclose(z2, z2_ref, atol=1e-5, rtol=1e-5)

    # Case 3: bf16 input stays bf16 end-to-end (native-dtype I/O path).
    N3, D3 = 64, 32
    x3 = jax.random.normal(keys[6], (N3, D3), dtype=jnp.float32).astype(jnp.bfloat16)
    mean3 = jax.random.normal(keys[7], (D3,), dtype=jnp.float32)
    std3 = jnp.abs(jax.random.normal(keys[8], (D3,), dtype=jnp.float32)) + 0.1

    y3 = jax.block_until_ready(
        gaussian_normalizer_forward(x3, mean3, std3, eps=EPS, inverse=False))
    assert y3.dtype == jnp.bfloat16
    y3_ref = (x3.astype(jnp.float32) - mean3[None, :]) / jnp.maximum(std3[None, :], EPS)
    assert jnp.allclose(y3.astype(jnp.float32), y3_ref, atol=3e-2, rtol=3e-2)

    # TODO(synk): update() (running mean/var accumulation + KL diagnostic) is
    # training-time state mutation, not part of the forward hot path; left in
    # plain JAX land.
    print("KERNEL_OK")
</pallas_src>

<mosaic_0001>
module attributes {stable_mosaic.version = 11 : i64} {
  func.func @_normalize_kernel(%arg0: i32, %arg1: memref<4x128xf32, #tpu.memory_space<vmem>>, %arg2: memref<1x128xf32, #tpu.memory_space<vmem>>, %arg3: memref<1x128xf32, #tpu.memory_space<vmem>>, %arg4: memref<4x128xf32, #tpu.memory_space<vmem>>) attributes {dimension_semantics = [#tpu.dimension_semantics<parallel>], iteration_bounds = array<i64: 1>, scalar_prefetch = 0 : i64, scratch_operands = 0 : i64, tpu.core_type = #tpu.core_type<tc>, window_params = [{transform_indices = @transform_0, window_bounds = array<i64: 4, 128>}, {pipeline_mode = #tpu.pipeline_mode<synchronous>, transform_indices = @transform_1, window_bounds = array<i64: 1, 128>}, {pipeline_mode = #tpu.pipeline_mode<synchronous>, transform_indices = @transform_2, window_bounds = array<i64: 1, 128>}, {transform_indices = @transform_3, window_bounds = array<i64: 4, 128>}]} {
    %c0 = arith.constant 0 : index
    %c0_0 = arith.constant 0 : index
    %0 = vector.load %arg1[%c0, %c0_0] : memref<4x128xf32, #tpu.memory_space<vmem>>, vector<4x128xf32>
    %c0_1 = arith.constant 0 : index
    %c0_2 = arith.constant 0 : index
    %1 = vector.load %arg2[%c0_1, %c0_2] : memref<1x128xf32, #tpu.memory_space<vmem>>, vector<1x128xf32>
    %2 = vector.broadcast %1 : vector<1x128xf32> to vector<4x128xf32>
    %3 = arith.subf %0, %2 : vector<4x128xf32>
    %c0_3 = arith.constant 0 : index
    %c0_4 = arith.constant 0 : index
    %4 = vector.load %arg3[%c0_3, %c0_4] : memref<1x128xf32, #tpu.memory_space<vmem>>, vector<1x128xf32>
    %5 = vector.broadcast %4 : vector<1x128xf32> to vector<4x128xf32>
    %6 = arith.mulf %3, %5 : vector<4x128xf32>
    %c0_5 = arith.constant 0 : index
    %c0_6 = arith.constant 0 : index
    %7 = vector.load %arg4[%c0_5, %c0_6] : memref<4x128xf32, #tpu.memory_space<vmem>>, vector<4x128xf32>
    tpu.vector_store %arg4[%c0_5, %c0_6], %6 {strides = array<i32>} : memref<4x128xf32, #tpu.memory_space<vmem>>, vector<4x128xf32>,
    return
  }
  func.func @transform_0(%arg0: i32) -> (i32, i32) {
    %c0_i32 = arith.constant 0 : i32
    %c0_i32_0 = arith.constant 0 : i32
    return %arg0, %c0_i32 : i32, i32
  }
  func.func @transform_1(%arg0: i32) -> (i32, i32) {
    %c0_i32 = arith.constant 0 : i32
    %c0_i32_0 = arith.constant 0 : i32
    %c0_i32_1 = arith.constant 0 : i32
    return %c0_i32, %c0_i32_0 : i32, i32
  }
  func.func @transform_2(%arg0: i32) -> (i32, i32) {
    %c0_i32 = arith.constant 0 : i32
    %c0_i32_0 = arith.constant 0 : i32
    %c0_i32_1 = arith.constant 0 : i32
    return %c0_i32, %c0_i32_0 : i32, i32
  }
  func.func @transform_3(%arg0: i32) -> (i32, i32) {
    %c0_i32 = arith.constant 0 : i32
    %c0_i32_0 = arith.constant 0 : i32
    return %arg0, %c0_i32 : i32, i32
  }
}

</mosaic_0001>

<bundles_post_ra>
// kernel: tpu_custom_call.1
= control target key start
LH: loop header
LB: loop body
LE: loop exit
PB: predicated region body
PF: predicated region fallthrough
CT: control target
= control target key end

     0   :  { %8 = vsyncpa [#allocation3], 0  ;;  %s164_s0 = inlined_call_operand.hbm [shape: f32[4,128], index: 0, kind: input, shape index: {}]   ;;  %s165_s1 = inlined_call_operand.vmem [shape: f32[1,128], index: 1, kind: input, shape index: {}]   ;;  %s166_s2 = inlined_call_operand.vmem [shape: f32[1,128], index: 2, kind: input, shape index: {}]   ;;  %s167_s3 = inlined_call_operand.hbm [shape: f32[4,128], index: 3, kind: output, shape index: {}]  }
   0x1   :  { %9 = vsyncpa [#allocation4], 0  ;;  %s112_s12 = smov [#allocation2]   ;;  %s64_s16 = scalar_lea.hbm %s164_s0, 64 }
   0x2   :  { %s16_s13 = sshll.u32 %s112_s12, 4  ;;  %p65_p0 = scmp.ne.s32.totalorder %s164_s0, %s64_s16  ;;  %s17_s13 = int_to_ptr.vmem [resolvable:$true] %s16_s13 }
   0x3   :  { %p68_p1 = scmp.lt.u32.totalorder %s64_s16, %s164_s0 }
   0x5   :  { %p70_p2 = pnand %p68_p1, %p65_p0 }
   0x7   :  { %73 = shalt.err (!%p70_p2)
}
   0x8   :  { %s74_s21 = scalar_lea.vmem %s17_s13, 64  ;;  %p79_p4 = scmp.lt.s32.totalorder %s17_s13, %s17_s13 }
   0x9   :  { %p75_p3 = scmp.ne.s32.totalorder %s17_s13, %s74_s21  ;;  %p80_p5 = scmp.lt.s32.totalorder %s74_s21, %s74_s21 }
   0xb   :  { %p81_p6 = por %p80_p5, %p79_p4 }
   0xd   :  { %p82_p7 = pnand %p81_p6, %p75_p3 }
   0xf   :  { %85 = shalt.err (!%p82_p7)
}
  0x10   :  { %19 = dma.hbm_to_vmem [thread:$0]  %s164_s0, 64, %s17_s13, [#allocation3]  }
  0x11   :  { %108 = dma.done.wait [#allocation3], 64  }
  0x12   :  { %109 = vsyncadd [#allocation3], 4294967232  ;;  %s113_s24 = smov [#allocation5]   ;;  %v27_v0 = vld [vmem:[#allocation2] sm:$0xf] }
  0x13   :  { %s51_s25 = sshll.u32 %s113_s24, 4  ;;  %v60_v1 = vld [vmem:[%s165_s1] ss:$0 sm:$0xff]  ;;  %s52_s25 = int_to_ptr.vmem [resolvable:$true] %s51_s25 }
  0x14   :  { %v61_v2 = vld [vmem:[%s166_s2] ss:$0 sm:$0xff]  ;;  %v35_v3 = vsub.f32 %v27_v0, %v60_v1  ;;  %s86_s30 = scalar_lea.vmem %s52_s25, 64  ;;  %p91_p9 = scmp.lt.s32.totalorder %s52_s25, %s52_s25 }
  0x15   :  { %p87_p8 = scmp.ne.s32.totalorder %s52_s25, %s86_s30  ;;  %p92_p10 = scmp.lt.s32.totalorder %s86_s30, %s86_s30 }
  0x16   :  { %v43_v4 = vmul.f32 %v61_v2, %v35_v3 }
  0x17   :  { %p93_p11 = por %p92_p10, %p91_p9 }
  0x18   :  { %44 = vst [vmem:[#allocation5] sm:$0xf] %v43_v4 }
  0x19   :  { %p94_p12 = pnand %p93_p11, %p87_p8 }
  0x1b   :  { %97 = shalt.err (!%p94_p12)
}
  0x1c   :  { %s98_s5 = scalar_lea.hbm %s167_s3, 64 }
  0x1d   :  { %p99_p13 = scmp.ne.s32.totalorder %s167_s3, %s98_s5  ;;  %p102_p0 = scmp.lt.u32.totalorder %s98_s5, %s167_s3 }
  0x1f   :  { %p104_p1 = pnand %p102_p0, %p99_p13 }
  0x21   :  { %107 = shalt.err (!%p104_p1)
}
  0x22   :  { %54 = dma.vmem_to_hbm [thread:$0]  %s52_s25, 64, %s167_s3, [#allocation4]  }
  0x23   :  { %110 = dma.done.wait [#allocation4], 64  }
  0x24   :  { %111 = vsyncadd [#allocation4], 4294967232 }
  0x25   :  { %58 = vsyncpa [#allocation3], 1 }
  0x26   :  { %59 = vsyncpa [#allocation4], 1 }

</bundles_post_ra>
